<compile_context>
chip_gen: v7x
topology: tpu7x:2x2x1
jax: 0.10.0
libtpu: 0.0.40
codegen_flags: <defaults>
</compile_context>

<pallas_src>
import functools

import jax
import jax.numpy as jnp
from jax.experimental import pallas as pl
from jax.experimental.pallas import tpu as pltpu


def _round_up(x, m):
    return ((x + m - 1) // m) * m


def _conv_stats_kernel(x_ref, w_ref, m_ref, y_ref, ps_ref, pss_ref, *, taps, l_pad):
    """Per-sample 3x3 conv (9 shifted matmuls) + partial BN statistics.

    x_ref  : (1, Cin, P_in)   bf16  zero-padded, flattened spatial axis
    w_ref  : (9, Cout, Cin)   bf16  one (Cout, Cin) matrix per tap
    m_ref  : (1, L_pad)       f32   1.0 on valid output positions, else 0.0
    y_ref  : (1, Cout, L_pad) f32   pre-BN conv output (transposed, lane-dense)
    ps_ref : (1, Cout, 1)     f32   per-channel partial sum over valid pixels
    pss_ref: (1, Cout, 1)     f32   per-channel partial sum of squares
    """
    acc = None
    for k, off in enumerate(taps):                     # static, unrolled 9-tap loop
        slab = x_ref[0, :, off:off + l_pad]            # (Cin, L_pad) bf16
        contrib = jnp.dot(w_ref[k], slab, preferred_element_type=jnp.float32)
        acc = contrib if acc is None else acc + contrib
    y_ref[0] = acc                                     # (Cout, L_pad) f32

    ym = acc * m_ref[...]                              # mask pad-columns / tail
    ps_ref[0] = jnp.sum(ym, axis=1, keepdims=True)
    pss_ref[0] = jnp.sum(ym * acc, axis=1, keepdims=True)


def _bn_act_kernel(y_ref, s_ref, t_ref, o_ref, *, negative_slope):
    """Folded BN affine (y * scale + shift) + LeakyReLU, lane-dense."""
    z = y_ref[0] * s_ref[...] + t_ref[...]             # (Cout, L_pad) f32
    o_ref[0] = jnp.where(z >= 0, z, negative_slope * z).astype(o_ref.dtype)


def single_conv(x_nchw, conv_w, conv_b, bn_gamma, bn_beta, *,
                is_leaky_relu=True, eps=1e-5):
    """Forward of SingleConv with training-mode BatchNorm.  x_nchw: (N,Cin,H,W) f32."""
    N, Cin, H, W = x_nchw.shape
    Cout = conv_w.shape[0]
    Wp = W + 2                                # padded width
    L_out = H * Wp                            # flat output length (incl. pad cols)
    L_pad = _round_up(L_out, 128)             # lane-dense output length
    max_off = 2 * Wp + 2                      # largest tap offset
    P_in = _round_up(max_off + L_pad, 128)    # flat (padded) input length

    # Glue: zero-pad spatially, flatten the padded plane, shift by +1 so all nine
    # tap offsets are >= 0, zero-fill the tail, cast to bf16 for the MXU.
    xp = jnp.pad(x_nchw, ((0, 0), (0, 0), (1, 1), (1, 1)))          # (N,Cin,H+2,Wp)
    xf = xp.reshape(N, Cin, (H + 2) * Wp)
    xf = jnp.pad(xf, ((0, 0), (0, 0), (1, P_in - (H + 2) * Wp - 1)))
    xf = xf.astype(jnp.bfloat16)

    # Tap k = dh*3 + dw reads flat offset dh*Wp + dw; its weight is conv_w[:,:,dh,dw].
    taps = tuple(dh * Wp + dw for dh in range(3) for dw in range(3))
    w9 = jnp.transpose(conv_w, (2, 3, 0, 1)).reshape(9, Cout, Cin).astype(jnp.bfloat16)

    # conv_b is intentionally unused: training-mode BatchNorm subtracts the batch
    # mean, so a per-channel bias added before BN cancels exactly (zero-cost, same
    # output).  (It would matter only for inference-mode BN with running stats.)
    del conv_b

    # Valid-output mask: drop the left/right pad columns and the rounded-up tail.
    q = jnp.arange(L_pad)
    col = q % Wp
    mask = ((q < L_out) & (col >= 1) & (col <= W)).astype(jnp.float32)[None, :]

    # ---------------- kernel 1: conv + partial BN statistics -----------------
    conv_cost = pl.CostEstimate(
        flops=2 * N * 9 * Cin * Cout * L_pad,
        transcendentals=0,
        bytes_accessed=(N * Cin * P_in * 2 + 9 * Cout * Cin * 2
                        + L_pad * 4 + N * Cout * (L_pad + 2) * 4),
    )
    y_full, psum, psumsq = pl.pallas_call(
        functools.partial(_conv_stats_kernel, taps=taps, l_pad=L_pad),
        grid=(N,),
        in_specs=[
            pl.BlockSpec((1, Cin, P_in), lambda n: (n, 0, 0)),
            pl.BlockSpec((9, Cout, Cin), lambda n: (0, 0, 0)),
            pl.BlockSpec((1, L_pad), lambda n: (0, 0)),
        ],
        out_specs=(
            pl.BlockSpec((1, Cout, L_pad), lambda n: (n, 0, 0)),
            pl.BlockSpec((1, Cout, 1), lambda n: (n, 0, 0)),
            pl.BlockSpec((1, Cout, 1), lambda n: (n, 0, 0)),
        ),
        out_shape=(
            jax.ShapeDtypeStruct((N, Cout, L_pad), jnp.float32),
            jax.ShapeDtypeStruct((N, Cout, 1), jnp.float32),
            jax.ShapeDtypeStruct((N, Cout, 1), jnp.float32),
        ),
        compiler_params=pltpu.CompilerParams(
            dimension_semantics=("parallel",),        # independent per-sample tiles
            vmem_limit_bytes=32 * 1024 * 1024,
        ),
        cost_estimate=conv_cost,
    )(xf, w9, mask)

    # Reduce partial stats (tiny (Cout,) work) and fold BN into one scale/shift.
    count = float(N * H * W)
    total = jnp.sum(psum[:, :, 0], axis=0)                   # (Cout,)
    total_sq = jnp.sum(psumsq[:, :, 0], axis=0)              # (Cout,)
    mean = total / count
    var = jnp.maximum(total_sq / count - mean * mean, 0.0)   # biased variance
    inv = jax.lax.rsqrt(var + eps)
    scale = (bn_gamma * inv).astype(jnp.float32)[:, None]            # (Cout, 1)
    shift = (bn_beta - mean * bn_gamma * inv).astype(jnp.float32)[:, None]

    # ---------------- kernel 2: normalize + LeakyReLU -------------------------
    slope = 0.2 if is_leaky_relu else 0.0
    act_cost = pl.CostEstimate(
        flops=3 * N * Cout * L_pad,
        transcendentals=0,
        bytes_accessed=2 * N * Cout * L_pad * 4 + 2 * Cout * 4,
    )
    out_full = pl.pallas_call(
        functools.partial(_bn_act_kernel, negative_slope=slope),
        grid=(N,),
        in_specs=[
            pl.BlockSpec((1, Cout, L_pad), lambda n: (n, 0, 0)),
            pl.BlockSpec((Cout, 1), lambda n: (0, 0)),
            pl.BlockSpec((Cout, 1), lambda n: (0, 0)),
        ],
        out_specs=pl.BlockSpec((1, Cout, L_pad), lambda n: (n, 0, 0)),
        out_shape=jax.ShapeDtypeStruct((N, Cout, L_pad), x_nchw.dtype),
        compiler_params=pltpu.CompilerParams(
            dimension_semantics=("parallel",),
            vmem_limit_bytes=32 * 1024 * 1024,
        ),
        cost_estimate=act_cost,
    )(y_full, scale, shift)

    # Drop pad columns / rounded tail; result is already in NCHW order.
    return out_full[:, :, :L_out].reshape(N, Cout, H, Wp)[:, :, :, 1:W + 1]


if __name__ == "__main__":
    # Small, deterministic setup: N=2, Cin=4, Cout(=mid)=8, H=W=16.
    N, Cin, Cout, H, W = 2, 4, 8, 16, 16

    key = jax.random.PRNGKey(0)
    kx, kw, kb = jax.random.split(key, 3)

    x = jax.random.normal(kx, (N, Cin, H, W), dtype=jnp.float32)

    fan_in = Cin * 3 * 3
    bound = 1.0 / (fan_in ** 0.5)
    conv_w = jax.random.uniform(kw, (Cout, Cin, 3, 3), jnp.float32, -bound, bound)
    conv_b = jax.random.uniform(kb, (Cout,), jnp.float32, -bound, bound)
    bn_gamma = jnp.ones((Cout,), jnp.float32)     # BatchNorm2d default weight
    bn_beta = jnp.zeros((Cout,), jnp.float32)     # BatchNorm2d default bias

    out = single_conv(x, conv_w, conv_b, bn_gamma, bn_beta, is_leaky_relu=True)
    out = jax.block_until_ready(out)
    assert out.shape == (N, Cout, H, W), out.shape

    # Pure-JAX f32 reference (bias included -- training-mode BN cancels it).
    y = jax.lax.conv_general_dilated(
        x, conv_w, window_strides=(1, 1), padding=((1, 1), (1, 1)),
        dimension_numbers=("NCHW", "OIHW", "NCHW"))
    y = y + conv_b.reshape(1, Cout, 1, 1)
    mu = jnp.mean(y, axis=(0, 2, 3), keepdims=True)
    va = jnp.mean((y - mu) ** 2, axis=(0, 2, 3), keepdims=True)
    yh = (y - mu) * jax.lax.rsqrt(va + 1e-5)
    yh = yh * bn_gamma.reshape(1, Cout, 1, 1) + bn_beta.reshape(1, Cout, 1, 1)
    ref = jnp.where(yh >= 0, yh, 0.2 * yh)
    err = float(jnp.max(jnp.abs(out - ref)))
    assert err < 0.1, f"max abs error vs reference: {err}"

    print("KERNEL_OK")
</pallas_src>

<mosaic_0001>
module attributes {stable_mosaic.version = 11 : i64} {
  func.func @_conv_stats_kernel(%arg0: i32, %arg1: memref<1x4x512xbf16, #tpu.memory_space<vmem>>, %arg2: memref<9x8x4xbf16, #tpu.memory_space<vmem>>, %arg3: memref<1x384xf32, #tpu.memory_space<vmem>>, %arg4: memref<1x8x384xf32, #tpu.memory_space<vmem>>, %arg5: memref<1x8x1xf32, #tpu.memory_space<vmem>>, %arg6: memref<1x8x1xf32, #tpu.memory_space<vmem>>) attributes {dimension_semantics = [#tpu.dimension_semantics<parallel>], iteration_bounds = array<i64: 2>, scalar_prefetch = 0 : i64, scratch_operands = 0 : i64, tpu.core_type = #tpu.core_type<tc>, window_params = [{transform_indices = @transform_0, window_bounds = array<i64: 1, 4, 512>}, {pipeline_mode = #tpu.pipeline_mode<synchronous>, transform_indices = @transform_1, window_bounds = array<i64: 9, 8, 4>}, {pipeline_mode = #tpu.pipeline_mode<synchronous>, transform_indices = @transform_2, window_bounds = array<i64: 1, 384>}, {transform_indices = @transform_3, window_bounds = array<i64: 1, 8, 384>}, {transform_indices = @transform_4, window_bounds = array<i64: 1, 8, 1>}, {transform_indices = @transform_5, window_bounds = array<i64: 1, 8, 1>}]} {
    %c0 = arith.constant 0 : index
    %c0_0 = arith.constant 0 : index
    %c0_1 = arith.constant 0 : index
    %0 = vector.load %arg1[%c0, %c0_0, %c0_1] : memref<1x4x512xbf16, #tpu.memory_space<vmem>>, vector<1x4x384xbf16>
    %1 = vector.shape_cast %0 : vector<1x4x384xbf16> to vector<4x384xbf16>
    %c0_2 = arith.constant 0 : index
    %c0_3 = arith.constant 0 : index
    %c0_4 = arith.constant 0 : index
    %2 = vector.load %arg2[%c0_2, %c0_3, %c0_4] : memref<9x8x4xbf16, #tpu.memory_space<vmem>>, vector<1x8x4xbf16>
    %3 = vector.shape_cast %2 : vector<1x8x4xbf16> to vector<8x4xbf16>
    %cst = arith.constant dense<0.000000e+00> : vector<8x384xf32>
    %4 = tpu.matmul %3, %1, %cst {dimension_numbers = #tpu.dot_dimension_numbers<[1], [0], [0], [1], [0, 0, 1, 1], [], []>} : vector<8x4xbf16>, vector<4x384xbf16>, vector<8x384xf32> -> vector<8x384xf32>
    %c0_5 = arith.constant 0 : index
    %c0_6 = arith.constant 0 : index
    %c1 = arith.constant 1 : index
    %5 = vector.load %arg1[%c0_5, %c0_6, %c1] : memref<1x4x512xbf16, #tpu.memory_space<vmem>>, vector<1x4x384xbf16>
    %6 = vector.shape_cast %5 : vector<1x4x384xbf16> to vector<4x384xbf16>
    %c1_7 = arith.constant 1 : index
    %c0_8 = arith.constant 0 : index
    %c0_9 = arith.constant 0 : index
    %7 = vector.load %arg2[%c1_7, %c0_8, %c0_9] : memref<9x8x4xbf16, #tpu.memory_space<vmem>>, vector<1x8x4xbf16>
    %8 = vector.shape_cast %7 : vector<1x8x4xbf16> to vector<8x4xbf16>
    %cst_10 = arith.constant dense<0.000000e+00> : vector<8x384xf32>
    %9 = tpu.matmul %8, %6, %cst_10 {dimension_numbers = #tpu.dot_dimension_numbers<[1], [0], [0], [1], [0, 0, 1, 1], [], []>} : vector<8x4xbf16>, vector<4x384xbf16>, vector<8x384xf32> -> vector<8x384xf32>
    %10 = arith.addf %4, %9 : vector<8x384xf32>
    %c0_11 = arith.constant 0 : index
    %c0_12 = arith.constant 0 : index
    %c2 = arith.constant 2 : index
    %11 = vector.load %arg1[%c0_11, %c0_12, %c2] : memref<1x4x512xbf16, #tpu.memory_space<vmem>>, vector<1x4x384xbf16>
    %12 = vector.shape_cast %11 : vector<1x4x384xbf16> to vector<4x384xbf16>
    %c2_13 = arith.constant 2 : index
    %c0_14 = arith.constant 0 : index
    %c0_15 = arith.constant 0 : index
    %13 = vector.load %arg2[%c2_13, %c0_14, %c0_15] : memref<9x8x4xbf16, #tpu.memory_space<vmem>>, vector<1x8x4xbf16>
    %14 = vector.shape_cast %13 : vector<1x8x4xbf16> to vector<8x4xbf16>
    %cst_16 = arith.constant dense<0.000000e+00> : vector<8x384xf32>
    %15 = tpu.matmul %14, %12, %cst_16 {dimension_numbers = #tpu.dot_dimension_numbers<[1], [0], [0], [1], [0, 0, 1, 1], [], []>} : vector<8x4xbf16>, vector<4x384xbf16>, vector<8x384xf32> -> vector<8x384xf32>
    %16 = arith.addf %10, %15 : vector<8x384xf32>
    %c0_17 = arith.constant 0 : index
    %c0_18 = arith.constant 0 : index
    %c18 = arith.constant 18 : index
    %17 = vector.load %arg1[%c0_17, %c0_18, %c18] : memref<1x4x512xbf16, #tpu.memory_space<vmem>>, vector<1x4x384xbf16>
    %18 = vector.shape_cast %17 : vector<1x4x384xbf16> to vector<4x384xbf16>
    %c3 = arith.constant 3 : index
    %c0_19 = arith.constant 0 : index
    %c0_20 = arith.constant 0 : index
    %19 = vector.load %arg2[%c3, %c0_19, %c0_20] : memref<9x8x4xbf16, #tpu.memory_space<vmem>>, vector<1x8x4xbf16>
    %20 = vector.shape_cast %19 : vector<1x8x4xbf16> to vector<8x4xbf16>
    %cst_21 = arith.constant dense<0.000000e+00> : vector<8x384xf32>
    %21 = tpu.matmul %20, %18, %cst_21 {dimension_numbers = #tpu.dot_dimension_numbers<[1], [0], [0], [1], [0, 0, 1, 1], [], []>} : vector<8x4xbf16>, vector<4x384xbf16>, vector<8x384xf32> -> vector<8x384xf32>
    %22 = arith.addf %16, %21 : vector<8x384xf32>
    %c0_22 = arith.constant 0 : index
    %c0_23 = arith.constant 0 : index
    %c19 = arith.constant 19 : index
    %23 = vector.load %arg1[%c0_22, %c0_23, %c19] : memref<1x4x512xbf16, #tpu.memory_space<vmem>>, vector<1x4x384xbf16>
    %24 = vector.shape_cast %23 : vector<1x4x384xbf16> to vector<4x384xbf16>
    %c4 = arith.constant 4 : index
    %c0_24 = arith.constant 0 : index
    %c0_25 = arith.constant 0 : index
    %25 = vector.load %arg2[%c4, %c0_24, %c0_25] : memref<9x8x4xbf16, #tpu.memory_space<vmem>>, vector<1x8x4xbf16>
    %26 = vector.shape_cast %25 : vector<1x8x4xbf16> to vector<8x4xbf16>
    %cst_26 = arith.constant dense<0.000000e+00> : vector<8x384xf32>
    %27 = tpu.matmul %26, %24, %cst_26 {dimension_numbers = #tpu.dot_dimension_numbers<[1], [0], [0], [1], [0, 0, 1, 1], [], []>} : vector<8x4xbf16>, vector<4x384xbf16>, vector<8x384xf32> -> vector<8x384xf32>
    %28 = arith.addf %22, %27 : vector<8x384xf32>
    %c0_27 = arith.constant 0 : index
    %c0_28 = arith.constant 0 : index
    %c20 = arith.constant 20 : index
    %29 = vector.load %arg1[%c0_27, %c0_28, %c20] : memref<1x4x512xbf16, #tpu.memory_space<vmem>>, vector<1x4x384xbf16>
    %30 = vector.shape_cast %29 : vector<1x4x384xbf16> to vector<4x384xbf16>
    %c5 = arith.constant 5 : index
    %c0_29 = arith.constant 0 : index
    %c0_30 = arith.constant 0 : index
    %31 = vector.load %arg2[%c5, %c0_29, %c0_30] : memref<9x8x4xbf16, #tpu.memory_space<vmem>>, vector<1x8x4xbf16>
    %32 = vector.shape_cast %31 : vector<1x8x4xbf16> to vector<8x4xbf16>
    %cst_31 = arith.constant dense<0.000000e+00> : vector<8x384xf32>
    %33 = tpu.matmul %32, %30, %cst_31 {dimension_numbers = #tpu.dot_dimension_numbers<[1], [0], [0], [1], [0, 0, 1, 1], [], []>} : vector<8x4xbf16>, vector<4x384xbf16>, vector<8x384xf32> -> vector<8x384xf32>
    %34 = arith.addf %28, %33 : vector<8x384xf32>
    %c0_32 = arith.constant 0 : index
    %c0_33 = arith.constant 0 : index
    %c36 = arith.constant 36 : index
    %35 = vector.load %arg1[%c0_32, %c0_33, %c36] : memref<1x4x512xbf16, #tpu.memory_space<vmem>>, vector<1x4x384xbf16>
    %36 = vector.shape_cast %35 : vector<1x4x384xbf16> to vector<4x384xbf16>
    %c6 = arith.constant 6 : index
    %c0_34 = arith.constant 0 : index
    %c0_35 = arith.constant 0 : index
    %37 = vector.load %arg2[%c6, %c0_34, %c0_35] : memref<9x8x4xbf16, #tpu.memory_space<vmem>>, vector<1x8x4xbf16>
    %38 = vector.shape_cast %37 : vector<1x8x4xbf16> to vector<8x4xbf16>
    %cst_36 = arith.constant dense<0.000000e+00> : vector<8x384xf32>
    %39 = tpu.matmul %38, %36, %cst_36 {dimension_numbers = #tpu.dot_dimension_numbers<[1], [0], [0], [1], [0, 0, 1, 1], [], []>} : vector<8x4xbf16>, vector<4x384xbf16>, vector<8x384xf32> -> vector<8x384xf32>
    %40 = arith.addf %34, %39 : vector<8x384xf32>
    %c0_37 = arith.constant 0 : index
    %c0_38 = arith.constant 0 : index
    %c37 = arith.constant 37 : index
    %41 = vector.load %arg1[%c0_37, %c0_38, %c37] : memref<1x4x512xbf16, #tpu.memory_space<vmem>>, vector<1x4x384xbf16>
    %42 = vector.shape_cast %41 : vector<1x4x384xbf16> to vector<4x384xbf16>
    %c7 = arith.constant 7 : index
    %c0_39 = arith.constant 0 : index
    %c0_40 = arith.constant 0 : index
    %43 = vector.load %arg2[%c7, %c0_39, %c0_40] : memref<9x8x4xbf16, #tpu.memory_space<vmem>>, vector<1x8x4xbf16>
    %44 = vector.shape_cast %43 : vector<1x8x4xbf16> to vector<8x4xbf16>
    %cst_41 = arith.constant dense<0.000000e+00> : vector<8x384xf32>
    %45 = tpu.matmul %44, %42, %cst_41 {dimension_numbers = #tpu.dot_dimension_numbers<[1], [0], [0], [1], [0, 0, 1, 1], [], []>} : vector<8x4xbf16>, vector<4x384xbf16>, vector<8x384xf32> -> vector<8x384xf32>
    %46 = arith.addf %40, %45 : vector<8x384xf32>
    %c0_42 = arith.constant 0 : index
    %c0_43 = arith.constant 0 : index
    %c38 = arith.constant 38 : index
    %47 = vector.load %arg1[%c0_42, %c0_43, %c38] : memref<1x4x512xbf16, #tpu.memory_space<vmem>>, vector<1x4x384xbf16>
    %48 = vector.shape_cast %47 : vector<1x4x384xbf16> to vector<4x384xbf16>
    %c8 = arith.constant 8 : index
    %c0_44 = arith.constant 0 : index
    %c0_45 = arith.constant 0 : index
    %49 = vector.load %arg2[%c8, %c0_44, %c0_45] : memref<9x8x4xbf16, #tpu.memory_space<vmem>>, vector<1x8x4xbf16>
    %50 = vector.shape_cast %49 : vector<1x8x4xbf16> to vector<8x4xbf16>
    %cst_46 = arith.constant dense<0.000000e+00> : vector<8x384xf32>
    %51 = tpu.matmul %50, %48, %cst_46 {dimension_numbers = #tpu.dot_dimension_numbers<[1], [0], [0], [1], [0, 0, 1, 1], [], []>} : vector<8x4xbf16>, vector<4x384xbf16>, vector<8x384xf32> -> vector<8x384xf32>
    %52 = arith.addf %46, %51 : vector<8x384xf32>
    %c0_47 = arith.constant 0 : index
    %c0_48 = arith.constant 0 : index
    %c0_49 = arith.constant 0 : index
    %53 = vector.load %arg4[%c0_47, %c0_48, %c0_49] : memref<1x8x384xf32, #tpu.memory_space<vmem>>, vector<1x8x384xf32>
    %54 = vector.shape_cast %53 : vector<1x8x384xf32> to vector<8x384xf32>
    %55 = vector.shape_cast %52 : vector<8x384xf32> to vector<1x8x384xf32>
    tpu.vector_store %arg4[%c0_47, %c0_48, %c0_49], %55 {strides = array<i32>} : memref<1x8x384xf32, #tpu.memory_space<vmem>>, vector<1x8x384xf32>,
    %c0_50 = arith.constant 0 : index
    %c0_51 = arith.constant 0 : index
    %56 = vector.load %arg3[%c0_50, %c0_51] : memref<1x384xf32, #tpu.memory_space<vmem>>, vector<1x384xf32>
    %57 = vector.broadcast %56 : vector<1x384xf32> to vector<8x384xf32>
    %58 = arith.mulf %52, %57 : vector<8x384xf32>
    %cst_52 = arith.constant dense<0.000000e+00> : vector<8xf32>
    %59 = vector.multi_reduction <add>, %58, %cst_52 [1] : vector<8x384xf32> to vector<8xf32>
    %60 = vector.shape_cast %59 : vector<8xf32> to vector<8x1xf32>
    %c0_53 = arith.constant 0 : index
    %c0_54 = arith.constant 0 : index
    %c0_55 = arith.constant 0 : index
    %61 = vector.load %arg5[%c0_53, %c0_54, %c0_55] : memref<1x8x1xf32, #tpu.memory_space<vmem>>, vector<1x8x1xf32>
    %62 = vector.shape_cast %61 : vector<1x8x1xf32> to vector<8x1xf32>
    %63 = vector.shape_cast %60 : vector<8x1xf32> to vector<1x8x1xf32>
    tpu.vector_store %arg5[%c0_53, %c0_54, %c0_55], %63 {strides = array<i32>} : memref<1x8x1xf32, #tpu.memory_space<vmem>>, vector<1x8x1xf32>,
    %64 = arith.mulf %58, %52 : vector<8x384xf32>
    %cst_56 = arith.constant dense<0.000000e+00> : vector<8xf32>
    %65 = vector.multi_reduction <add>, %64, %cst_56 [1] : vector<8x384xf32> to vector<8xf32>
    %66 = vector.shape_cast %65 : vector<8xf32> to vector<8x1xf32>
    %c0_57 = arith.constant 0 : index
    %c0_58 = arith.constant 0 : index
    %c0_59 = arith.constant 0 : index
    %67 = vector.load %arg6[%c0_57, %c0_58, %c0_59] : memref<1x8x1xf32, #tpu.memory_space<vmem>>, vector<1x8x1xf32>
    %68 = vector.shape_cast %67 : vector<1x8x1xf32> to vector<8x1xf32>
    %69 = vector.shape_cast %66 : vector<8x1xf32> to vector<1x8x1xf32>
    tpu.vector_store %arg6[%c0_57, %c0_58, %c0_59], %69 {strides = array<i32>} : memref<1x8x1xf32, #tpu.memory_space<vmem>>, vector<1x8x1xf32>,
    return
  }
  func.func @transform_0(%arg0: i32) -> (i32, i32, i32) {
    %c0_i32 = arith.constant 0 : i32
    %c0_i32_0 = arith.constant 0 : i32
    %c0_i32_1 = arith.constant 0 : i32
    return %arg0, %c0_i32, %c0_i32_0 : i32, i32, i32
  }
  func.func @transform_1(%arg0: i32) -> (i32, i32, i32) {
    %c0_i32 = arith.constant 0 : i32
    %c0_i32_0 = arith.constant 0 : i32
    %c0_i32_1 = arith.constant 0 : i32
    %c0_i32_2 = arith.constant 0 : i32
    return %c0_i32, %c0_i32_0, %c0_i32_1 : i32, i32, i32
  }
  func.func @transform_2(%arg0: i32) -> (i32, i32) {
    %c0_i32 = arith.constant 0 : i32
    %c0_i32_0 = arith.constant 0 : i32
    %c0_i32_1 = arith.constant 0 : i32
    return %c0_i32, %c0_i32_0 : i32, i32
  }
  func.func @transform_3(%arg0: i32) -> (i32, i32, i32) {
    %c0_i32 = arith.constant 0 : i32
    %c0_i32_0 = arith.constant 0 : i32
    %c0_i32_1 = arith.constant 0 : i32
    return %arg0, %c0_i32, %c0_i32_0 : i32, i32, i32
  }
  func.func @transform_4(%arg0: i32) -> (i32, i32, i32) {
    %c0_i32 = arith.constant 0 : i32
    %c0_i32_0 = arith.constant 0 : i32
    %c0_i32_1 = arith.constant 0 : i32
    return %arg0, %c0_i32, %c0_i32_0 : i32, i32, i32
  }
  func.func @transform_5(%arg0: i32) -> (i32, i32, i32) {
    %c0_i32 = arith.constant 0 : i32
    %c0_i32_0 = arith.constant 0 : i32
    %c0_i32_1 = arith.constant 0 : i32
    return %arg0, %c0_i32, %c0_i32_0 : i32, i32, i32
  }
}

</mosaic_0001>

<bundles_post_ra>
// kernel: tpu_custom_call.1
= control target key start
LH: loop header
LB: loop body
LE: loop exit
PB: predicated region body
PF: predicated region fallthrough
CT: control target
= control target key end

     0   :  { %11 = vsyncpa [#allocation3], 0  ;;  %s2158_s0 = inlined_call_operand.vmem [shape: bf16[2,4,512], index: 0, kind: input, shape index: {}]   ;;  %s2159_s1 = inlined_call_operand.vmem [shape: bf16[9,8,4], index: 1, kind: input, shape index: {}]   ;;  %s2160_s2 = inlined_call_operand.vmem [shape: f32[1,384], index: 2, kind: input, shape index: {}]   ;;  %s2161_s3 = inlined_call_operand.hbm [shape: f32[2,8,384], index: 3, kind: output, shape index: {0}]   ;;  %s2162_s4 = inlined_call_operand.vmem [shape: f32[2,8,1], index: 4, kind: output, shape index: {1}]   ;;  %s2163_s5 = inlined_call_operand.vmem [shape: f32[2,8,1], index: 5, kind: output, shape index: {2}]  }
   0x1   :  { %13 = vsyncpa [#allocation3 + $0x1], 0  ;;  %s1906_s18 = smov 0   ;;  %s1908_s19 = smov 0  }
   0x2   :  { %s1910_s20 = smov 0   ;;  %s1912_s21 = smov 0  }
   0x3 LB: > { %s1927_s22 = sadd.s32 4294967295, %s1861_s21   ;;  %s1561_s23 = sadd.s32 4294967294, %s1861_s21   ;;  %s1861_s21 = sphi %s1912_s21, %s2169_s21   ;;  %s1857_s20 = sphi %s1910_s20, %s2168_s20   ;;  %s1853_s19 = sphi %s1908_s19, %s2167_s19   ;;  %s1849_s18 = sphi %s1906_s18, %s2166_s18  }
   0x4   : > { %s1931_s24 = sadd.s32 1, %s1861_s21   ;;  %s94_s25 = sadd.s32 1, %s1857_s20 }
   0x5   : > { %s91_s26 = ssub.s32 %s1861_s21, %s1931_s24  ;;  %p104_p0 = scmp.ne.s32.totalorder %s1857_s20, %s1853_s19 }
   0x6   : > { %p92_p1 = scmp.eq.s32.totalorder %s91_s26, 0  ;;  %p105_p2 = scmp.eq.s32.totalorder %s1927_s22, 1 }
   0x7   : > { %p110_p3 = scmp.ne.s32.totalorder %s1853_s19, %s1849_s18  ;;  %p111_p4 = scmp.eq.s32.totalorder %s1561_s23, 1 }
   0x8   : > { %s1942_s27 = scalar_select %p92_p1, %s1857_s20, %s94_s25  }
   0x9   : > { %p1944_p5 = por %p105_p2, %p104_p0  ;;  %p1948_p6 = por %p111_p4, %p110_p3 }
   0xa   : > { %p1564_p7 = scmp.ge.s32.totalorder %s1861_s21, 1  ;;  %p195_p8 = scmp.lt.s32.totalorder %s1861_s21, 3 }
   0xc   : > { %p196_p9 = pnand %p1564_p7, %p195_p8 }
   0xd   : > { %p231_p10 = scmp.lt.s32.totalorder (!%p196_p9), %s1927_s22, 1  ;;  %v255_v0 = vlaneseq (!%p196_p9)  ;;  %v1863_v1 = vmov (!%p196_p9), 1983009808   ;;  %v1864_v5 = vmov (!%p196_p9), 0.0   ;;  %v1865_v6 = vmov (!%p196_p9), 0   ;;  %s1867_s10 = smov (!%p196_p9), 127  }
   0xe   : > { %199 = sbr.rel (%p196_p9) target bundleno = 612 (0x264), region = 32  ;;  %v253_v2 = vunpack.c.l.s4 (!%p196_p9), %v1863_v1  ;;  %1626 = vmatprep.subr.bf16.mxu1 (!%p196_p9), %v1864_v5  ;;  %326 = vmatprep.mubr.bf16.mxu0 (!%p196_p9), %v1865_v6  ;;  %vm1866_vm0 = vmmov (!%p196_p9), 0   ;;  %s1868_s11 = smov (!%p196_p9), 126   ;;  %vm276_vm1 = vcmask (!%p196_p9), 1039360   ;;  %vm284_vm2 = vcmask (!%p196_p9), 1041408  }
   0xf   : > { %v1956_v3 = vshrl.u32 (!%p196_p9), %v255_v0, 7  ;;  %1628 = vmatprep.mubr.msk.bf16.mxu1 (!%p196_p9), %vm1866_vm0, %v1864_v5  ;;  %s1869_s12 = smov (!%p196_p9), 110   ;;  %s1870_s13 = smov (!%p196_p9), 109   ;;  %v1569_v27 = vld [vmem:[%s2159_s1 + $0x4] sm:$0xf] (!%p196_p9)  ;;  %vm280_vm3 = vcmask (!%p196_p9), 31744  }
  0x10   : > { %v254_v4 = vunpack.c.0.s8 (!%p196_p9), %v253_v2  ;;  %s1871_s14 = smov (!%p196_p9), 108   ;;  %s1872_s15 = smov (!%p196_p9), 92   ;;  %vm514_vm4 = vcmask (!%p196_p9), 1031168   ;;  %vm643_vm5 = vcmask (!%p196_p9), 900096   ;;  %v246_v40 = vld [vmem:[%s2159_s1] sm:$0xf] (!%p196_p9) }
  0x11   : > { %s1873_s16 = smov (!%p196_p9), 91   ;;  %s1874_s17 = smov (!%p196_p9), 90   ;;  %vm772_vm6 = vcmask (!%p196_p9), 891904   ;;  %v1576_v51 = vld [vmem:[%s2159_s1 + $0x8] sm:$0xf] (!%p196_p9)  ;;  %vm901_vm7 = vcmask (!%p196_p9), 883712  }
  0x12   : > { %v257_v7 = vsub.s32 (!%p196_p9), %v254_v4, %v1956_v3  ;;  %v1580_v61 = vld [vmem:[%s2159_s1 + $0xc] sm:$0xf] (!%p196_p9)  ;;  %vm1030_vm8 = vcmask (!%p196_p9), 752640   ;;  %vm1159_vm9 = vcmask (!%p196_p9), 744448   ;;  %vm1288_vm10 = vcmask (!%p196_p9), 736256   ;;  %s1875_s23 = smov (!%p196_p9), [#allocation2]  }
  0x13   : > { %s1803_s25 = sshll.u32 (!%p196_p9), %s1875_s23, 4  ;;  %s1804_s25 = int_to_ptr.vmem [resolvable:$false] %s1803_s25 }
  0x14   : > { %s1805_s26 = scalar_lea.vmem (!%p196_p9), %s1804_s25, 768 }
  0x15   : > { %s232_s30 = scalar_select %p231_p10, %s1927_s22, 1 }
  0x17   : > { %s1960_s6 = sshll.u32 %s232_s30, 3  ;;  %s216_s30 = sand.u32 1, %s1853_s19  }
  0x18   : > { %s235_s9 = scalar_lea.vmem %s2158_s0, %s1960_s6  ;;  %s1744_s7 = smul.u32 24, %s216_s30 }
  0x19   : > { %v247_v8 = vld [vmem:[%s235_s9] sm:$0xff] }
  0x1a   : > { %v245_v9 = vld [vmem:[%s235_s9] sm:$0x3f]  ;;  %v258_v10 = vrot.slane %v247_v8, %v257_v7  ;;  %v251_v11 = vcombine.high %v247_v8, %v247_v8 }
  0x1b   : > { %v1969_v12 = vrot.slane %v245_v9, %v257_v7  ;;  %v376_v13 = vcombine.high %v245_v9, %v245_v9 }
  0x1c   : > { %268 = vrot.lane.b32.xlu0 %v258_v10, %s1867_s10  ;;  %v266_v14 = vcombine.high %v258_v10, %v258_v10  ;;  %v265_v15 = vrot.slane %v251_v11, %v257_v7 }
  0x1d   : > { %v390_v16 = vrot.slane %v376_v13, %v257_v7  ;;  %v391_v21 = vcombine.high %v1969_v12, %v1969_v12  ;;  %v396_v29 = vsel %vm284_vm2, %v1969_v12, 0 }
  0x1e   : > { %272 = vrot.lane.b32.xlu1 %v265_v15, %s1867_s10  ;;  %v267_v17 = vcombine.high %v265_v15, %v265_v15 }
  0x1f   : > { %v402_v31 = vsel %vm284_vm2, %v390_v16, 0 }
  0x20   : > { %270 = vrot.lane.b32.xlu0 %v266_v14, %s1867_s10 }
  0x22   : > { %274 = vrot.lane.b32.xlu1 %v267_v17, %s1867_s10  ;;  %s218_s10 = scalar_lea.vmem [#allocation2], %s1744_s7 }
  0x24   : > { %506 = vrot.lane.b32.xlu0 %v258_v10, %s1868_s11 }
  0x26   : > { %508 = vrot.lane.b32.xlu1 %v266_v14, %s1868_s11 }
  0x28   : > { %510 = vrot.lane.b32.xlu0 %v265_v15, %s1868_s11 }
  0x2a   : > { %512 = vrot.lane.b32.xlu1 %v267_v17, %s1868_s11  ;;  %s1745_s11 = smul.u32 384, %s1927_s22 }
  0x2c   : > { %635 = vrot.lane.b32.xlu0 %v258_v10, %s1869_s12 }
  0x2e   : > { %637 = vrot.lane.b32.xlu1 %v266_v14, %s1869_s12 }
  0x30   : > { %639 = vrot.lane.b32.xlu0 %v265_v15, %s1869_s12 }
  0x32   : > { %641 = vrot.lane.b32.xlu1 %v267_v17, %s1869_s12  ;;  %s1448_s12 = sshll.u32 %s218_s10, 4  ;;  %s1449_s12 = int_to_ptr.vmem [resolvable:$true] %s1448_s12 }
  0x33   : > { %p1806_p0 = scmp.lt.s32.totalorder %s1449_s12, %s1804_s25 }
  0x34   : > { %764 = vrot.lane.b32.xlu0 %v258_v10, %s1870_s13 }
  0x36   : > { %766 = vrot.lane.b32.xlu1 %v266_v14, %s1870_s13 }
  0x38   : > { %768 = vrot.lane.b32.xlu0 %v265_v15, %s1870_s13 }
  0x3a   : > { %770 = vrot.lane.b32.xlu1 %v267_v17, %s1870_s13 }
  0x3c   : > { %893 = vrot.lane.b32.xlu0 %v258_v10, %s1871_s14 }
  0x3e   : > { %895 = vrot.lane.b32.xlu1 %v266_v14, %s1871_s14 }
  0x40   : > { %897 = vrot.lane.b32.xlu0 %v265_v15, %s1871_s14 }
  0x42   : > { %899 = vrot.lane.b32.xlu1 %v267_v17, %s1871_s14 }
  0x44   : > { %1022 = vrot.lane.b32.xlu0 %v258_v10, %s1872_s15 }
  0x46   : > { %1024 = vrot.lane.b32.xlu1 %v266_v14, %s1872_s15 }
  0x48   : > { %1026 = vrot.lane.b32.xlu0 %v265_v15, %s1872_s15 }
  0x4a   : > { %1028 = vrot.lane.b32.xlu1 %v267_v17, %s1872_s15  ;;  %s2112_s15 = scalar_lea.hbm %s2161_s3, %s1745_s11 }
  0x4c   : > { %1151 = vrot.lane.b32.xlu0 %v258_v10, %s1873_s16 }
  0x4e   : > { %1153 = vrot.lane.b32.xlu1 %v266_v14, %s1873_s16 }
  0x50   : > { %1155 = vrot.lane.b32.xlu0 %v265_v15, %s1873_s16 }
  0x52   : > { %1157 = vrot.lane.b32.xlu1 %v267_v17, %s1873_s16  ;;  %s1426_s16 = scalar_lea.sflag [#allocation3], %s216_s30 }
  0x54   : > { %1280 = vrot.lane.b32.xlu0 %v258_v10, %s1874_s17  ;;  %v1584_v10 = vld [vmem:[%s2159_s1 + $0x10] sm:$0xf] }
  0x56   : > { %1282 = vrot.lane.b32.xlu1 %v266_v14, %s1874_s17 }
  0x58   : > { %1284 = vrot.lane.b32.xlu0 %v265_v15, %s1874_s17 }
  0x5a   : > { %1286 = vrot.lane.b32.xlu1 %v267_v17, %s1874_s17  ;;  %s1799_s17 = scalar_lea.vmem %s1449_s12, 384 }
  0x5b   : > { %p1800_p11 = scmp.ne.s32.totalorder %s1449_s12, %s1799_s17  ;;  %p1807_p1 = scmp.lt.s32.totalorder %s1805_s26, %s1799_s17 }
  0x5d   : > { %p1801_p12 = pnand %p1800_p11, %p1944_p5  ;;  %p1808_p2 = por %p1807_p1, %p1806_p0 }
  0x5f   : > { %p1802_p13 = pneg %p1801_p12 }
  0x61   : > { %p1809_p3 = pnand %p1808_p2, %p1802_p13 }
  0x8e   : > { %v269_v18 = vpop.permute.xlu0 %268 }
  0x90   : > { %v273_v19 = vpop.permute.xlu1 %272 }
  0x92   : > { %v271_v20 = vpop.permute.xlu0 %270 }
  0x93   : > { %v278_v22 = vsel %vm276_vm1, %v271_v20, %v273_v19  ;;  %v277_v23 = vsel %vm276_vm1, %v269_v18, %v271_v20  ;;  %v1588_v20 = vld [vmem:[%s2159_s1 + $0x14] sm:$0xf] }
  0x94   : > { %1570 = vmatprep.subr.msk.bf16.mxu0 %vm284_vm2, %v278_v22  ;;  %v275_v24 = vpop.permute.xlu1 %274  ;;  %v286_v25 = vsel %vm284_vm2, %v277_v23, 0 }
  0x95   : > { %295 = vmatpush1.bf16.msra.mxu0 %v286_v25  ;;  %v279_v26 = vsel %vm276_vm1, %v273_v19, %v275_v24 }
  0x96   : > { %v292_v28 = vsel %vm284_vm2, %v279_v26, 0  ;;  %1573 = vmatprep.subr.msk.bf16.mxu0 %vm284_vm2, %v391_v21  ;;  %v507_v30 = vpop.permute.xlu0 %506 }
  0x97   : > { %1627 = vmatpush3.bf16.msra.mxu1 %v292_v28 }
  0x98   : > { %1571 = vmatmul.mubr.msk.bf16.vlgmr.msra.gmra.mrb[0].mxu0 %vm280_vm3, %v1569_v27  ;;  %1632 = vmatprep.subr.bf16.mxu1 %v1864_v5  ;;  %v509_v32 = vpop.permute.xlu1 %508 }
  0x99   : > { %405 = vmatpush1.bf16.msra.mxu0 %v396_v29  ;;  %436 = vmatprep.mubr.bf16.mxu0 %v1865_v6  ;;  %v515_v37 = vsel %vm514_vm4, %v507_v30, %v509_v32  ;;  %v1592_v30 = vld [vmem:[%s2159_s1 + $0x18] sm:$0xf] }
  0x9a   : > { %1629 = vmatmul.mubr.msk.bf16.vlgmr.msra.gmra.mrb[0].mxu1 %vm280_vm3, %v1569_v27  ;;  %v511_v33 = vpop.permute.xlu0 %510  ;;  %v522_v41 = vsel %vm284_vm2, %v515_v37, 0  ;;  %v1596_v37 = vld [vmem:[%s2159_s1 + $0x1c] sm:$0xf] }
  0x9b   : > { %1633 = vmatpush3.bf16.msra.mxu1 %v402_v31  ;;  %v516_v34 = vsel %vm514_vm4, %v509_v32, %v511_v33  ;;  %1634 = vmatprep.mubr.msk.bf16.mxu1 %vm1866_vm0, %v1864_v5 }
  0x9c   : > { %v513_v35 = vpop.permute.xlu1 %512  ;;  %1577 = vmatprep.subr.msk.bf16.mxu0 %vm284_vm2, %v516_v34  ;;  %1638 = vmatprep.subr.bf16.mxu1 %v1864_v5 }
  0x9d   : > { %v517_v39 = vsel %vm514_vm4, %v511_v33, %v513_v35 }
  0x9e   : > { %v636_v36 = vpop.permute.xlu0 %635  ;;  %v528_v44 = vsel %vm284_vm2, %v517_v39, 0 }
  0xa0   : > { %v638_v38 = vpop.permute.xlu1 %637 }
  0xa1   : > { %v644_v47 = vsel %vm643_vm5, %v636_v36, %v638_v38 }
  0xa2   : > { %v640_v42 = vpop.permute.xlu0 %639  ;;  %v651_v52 = vsel %vm284_vm2, %v644_v47, 0 }
  0xa3   : > { %v645_v43 = vsel %vm643_vm5, %v638_v38, %v640_v42 }
  0xa4   : > { %1574 = vmatmul.mubr.msk.bf16.vlgmr.msra.gmra.mrb[0].mxu0 %vm280_vm3, %v246_v40  ;;  %v642_v46 = vpop.permute.xlu1 %641 }
  0xa5   : > { %531 = vmatpush1.bf16.msra.mxu0 %v522_v41  ;;  %562 = vmatprep.mubr.bf16.mxu0 %v1865_v6  ;;  %v646_v50 = vsel %vm643_vm5, %v640_v42, %v642_v46  ;;  %v1395_v41 = vsub.s32 0, %v1956_v3  ;;  %v1399_v42 = vsub.s32 1, %v1956_v3 }
  0xa6   : > { %1635 = vmatmul.mubr.msk.bf16.vlgmr.msra.gmra.mrb[0].mxu1 %vm280_vm3, %v246_v40  ;;  %1581 = vmatprep.subr.msk.bf16.mxu0 %vm284_vm2, %v645_v43  ;;  %v765_v45 = vpop.permute.xlu0 %764  ;;  %v657_v54 = vsel %vm284_vm2, %v646_v50, 0  ;;  %v1600_v40 = vld [vmem:[%s2159_s1 + $0x20] sm:$0xf] }
  0xa7   : > { %1639 = vmatpush3.bf16.msra.mxu1 %v528_v44  ;;  %1640 = vmatprep.mubr.msk.bf16.mxu1 %vm1866_vm0, %v1864_v5 }
  0xa8   : > { %1644 = vmatprep.subr.bf16.mxu1 %v1864_v5  ;;  %v767_v48 = vpop.permute.xlu1 %766 }
  0xa9   : > { %v773_v57 = vsel %vm772_vm6, %v765_v45, %v767_v48 }
  0xaa   : > { %v769_v49 = vpop.permute.xlu0 %768  ;;  %v780_v62 = vsel %vm284_vm2, %v773_v57, 0 }
  0xab   : > { %v774_v53 = vsel %vm772_vm6, %v767_v48, %v769_v49 }
  0xac   : > { %v771_v56 = vpop.permute.xlu1 %770 }
  0xad   : > { %v775_v60 = vsel %vm772_vm6, %v769_v49, %v771_v56 }
  0xae   : > { %v894_v55 = vpop.permute.xlu0 %893  ;;  %v786_v0 = vsel %vm284_vm2, %v775_v60, 0 }
  0xb0   : > { %1578 = vmatmul.mubr.msk.bf16.vlgmr.msra.gmra.mrb[0].mxu0 %vm280_vm3, %v1576_v51  ;;  %v896_v58 = vpop.permute.xlu1 %895 }
  0xb1   : > { %660 = vmatpush1.bf16.msra.mxu0 %v651_v52  ;;  %691 = vmatprep.mubr.bf16.mxu0 %v1865_v6  ;;  %v902_v4 = vsel %vm901_vm7, %v894_v55, %v896_v58 }
  0xb2   : > { %1641 = vmatmul.mubr.msk.bf16.vlgmr.msra.gmra.mrb[0].mxu1 %vm280_vm3, %v1576_v51  ;;  %1585 = vmatprep.subr.msk.bf16.mxu0 %vm284_vm2, %v774_v53  ;;  %v898_v59 = vpop.permute.xlu0 %897  ;;  %v909_v11 = vsel %vm284_vm2, %v902_v4, 0 }
  0xb3   : > { %1645 = vmatpush3.bf16.msra.mxu1 %v657_v54  ;;  %1646 = vmatprep.mubr.msk.bf16.mxu1 %vm1866_vm0, %v1864_v5  ;;  %v903_v63 = vsel %vm901_vm7, %v896_v58, %v898_v59 }
  0xb4   : > { %1650 = vmatprep.subr.bf16.mxu1 %v1864_v5  ;;  %v900_v2 = vpop.permute.xlu1 %899 }
  0xb5   : > { %v904_v9 = vsel %vm901_vm7, %v898_v59, %v900_v2 }
  0xb6   : > { %v1023_v1 = vpop.permute.xlu0 %1022  ;;  %v915_v13 = vsel %vm284_vm2, %v904_v9, 0 }
  0xb8   : > { %v1025_v7 = vpop.permute.xlu1 %1024 }
  0xb9   : > { %v1031_v16 = vsel %vm1030_vm8, %v1023_v1, %v1025_v7 }
  0xba   : > { %v1027_v8 = vpop.permute.xlu0 %1026  ;;  %v1038_v21 = vsel %vm284_vm2, %v1031_v16, 0 }
  0xbb   : > { %v1032_v12 = vsel %vm1030_vm8, %v1025_v7, %v1027_v8 }
  0xbc   : > { %1582 = vmatmul.mubr.msk.bf16.vlgmr.msra.gmra.mrb[0].mxu0 %vm280_vm3, %v1580_v61  ;;  %v1029_v15 = vpop.permute.xlu1 %1028 }
  0xbd   : > { %789 = vmatpush1.bf16.msra.mxu0 %v780_v62  ;;  %820 = vmatprep.mubr.bf16.mxu0 %v1865_v6  ;;  %v1033_v19 = vsel %vm1030_vm8, %v1027_v8, %v1029_v15 }
  0xbe   : > { %1647 = vmatmul.mubr.msk.bf16.vlgmr.msra.gmra.mrb[0].mxu1 %vm280_vm3, %v1580_v61  ;;  %1589 = vmatprep.subr.msk.bf16.mxu0 %vm284_vm2, %v903_v63  ;;  %v1152_v14 = vpop.permute.xlu0 %1151  ;;  %v1044_v23 = vsel %vm284_vm2, %v1033_v19, 0 }
  0xbf   : > { %1651 = vmatpush3.bf16.msra.mxu1 %v786_v0  ;;  %1652 = vmatprep.mubr.msk.bf16.mxu1 %vm1866_vm0, %v1864_v5 }
  0xc0   : > { %1656 = vmatprep.subr.bf16.mxu1 %v1864_v5  ;;  %v1154_v17 = vpop.permute.xlu1 %1153 }
  0xc1   : > { %v1160_v26 = vsel %vm1159_vm9, %v1152_v14, %v1154_v17 }
  0xc2   : > { %v1156_v18 = vpop.permute.xlu0 %1155  ;;  %v1167_v31 = vsel %vm284_vm2, %v1160_v26, 0 }
  0xc3   : > { %v1161_v22 = vsel %vm1159_vm9, %v1154_v17, %v1156_v18 }
  0xc4   : > { %v1158_v25 = vpop.permute.xlu1 %1157 }
  0xc5   : > { %v1162_v29 = vsel %vm1159_vm9, %v1156_v18, %v1158_v25 }
  0xc6   : > { %v1281_v24 = vpop.permute.xlu0 %1280  ;;  %v1173_v33 = vsel %vm284_vm2, %v1162_v29, 0 }
  0xc8   : > { %1586 = vmatmul.mubr.msk.bf16.vlgmr.msra.gmra.mrb[0].mxu0 %vm280_vm3, %v1584_v10  ;;  %v1283_v27 = vpop.permute.xlu1 %1282 }
  0xc9   : > { %918 = vmatpush1.bf16.msra.mxu0 %v909_v11  ;;  %949 = vmatprep.mubr.bf16.mxu0 %v1865_v6  ;;  %v1289_v35 = vsel %vm1288_vm10, %v1281_v24, %v1283_v27 }
  0xca   : > { %1653 = vmatmul.mubr.msk.bf16.vlgmr.msra.gmra.mrb[0].mxu1 %vm280_vm3, %v1584_v10  ;;  %1593 = vmatprep.subr.msk.bf16.mxu0 %vm284_vm2, %v1032_v12  ;;  %v1285_v28 = vpop.permute.xlu0 %1284  ;;  %v1296_v38 = vsel %vm284_vm2, %v1289_v35, 0 }
  0xcb   : > { %1657 = vmatpush3.bf16.msra.mxu1 %v915_v13  ;;  %1658 = vmatprep.mubr.msk.bf16.mxu1 %vm1866_vm0, %v1864_v5  ;;  %v1290_v32 = vsel %vm1288_vm10, %v1283_v27, %v1285_v28 }
  0xcc   : > { %1662 = vmatprep.subr.bf16.mxu1 %v1864_v5  ;;  %v1287_v34 = vpop.permute.xlu1 %1286 }
  0xcd   : > { %v1291_v36 = vsel %vm1288_vm10, %v1285_v28, %v1287_v34 }
  0xce   : > { %v1302_v39 = vsel %vm284_vm2, %v1291_v36, 0 }
  0xd4   : > { %1590 = vmatmul.mubr.msk.bf16.vlgmr.msra.gmra.mrb[0].mxu0 %vm280_vm3, %v1588_v20 }
  0xd5   : > { %1047 = vmatpush1.bf16.msra.mxu0 %v1038_v21  ;;  %1078 = vmatprep.mubr.bf16.mxu0 %v1865_v6 }
  0xd6   : > { %1659 = vmatmul.mubr.msk.bf16.vlgmr.msra.gmra.mrb[0].mxu1 %vm280_vm3, %v1588_v20  ;;  %1597 = vmatprep.subr.msk.bf16.mxu0 %vm284_vm2, %v1161_v22 }
  0xd7   : > { %1663 = vmatpush3.bf16.msra.mxu1 %v1044_v23  ;;  %1664 = vmatprep.mubr.msk.bf16.mxu1 %vm1866_vm0, %v1864_v5 }
  0xd8   : > { %1668 = vmatprep.subr.bf16.mxu1 %v1864_v5 }
  0xe0   : > { %1594 = vmatmul.mubr.msk.bf16.vlgmr.msra.gmra.mrb[0].mxu0 %vm280_vm3, %v1592_v30 }
  0xe1   : > { %1176 = vmatpush1.bf16.msra.mxu0 %v1167_v31  ;;  %1207 = vmatprep.mubr.bf16.mxu0 %v1865_v6 }
  0xe2   : > { %1665 = vmatmul.mubr.msk.bf16.vlgmr.msra.gmra.mrb[0].mxu1 %vm280_vm3, %v1592_v30  ;;  %1601 = vmatprep.subr.msk.bf16.mxu0 %vm284_vm2, %v1290_v32 }
  0xe3   : > { %1669 = vmatpush3.bf16.msra.mxu1 %v1173_v33  ;;  %1670 = vmatprep.mubr.msk.bf16.mxu1 %vm1866_vm0, %v1864_v5 }
  0xe4   : > { %1674 = vmatprep.subr.bf16.mxu1 %v1864_v5 }
  0xec   : > { %1598 = vmatmul.mubr.msk.bf16.vlgmr.msra.gmra.mrb[0].mxu0 %vm280_vm3, %v1596_v37 }
  0xed   : > { %1305 = vmatpush1.bf16.msra.mxu0 %v1296_v38  ;;  %1336 = vmatprep.mubr.bf16.mxu0 %v1865_v6  ;;  %v1391_v6 = vld [vmem:[%s2160_s2] sm:$0x7] }
  0xee   : > { %1671 = vmatmul.mubr.msk.bf16.vlgmr.msra.gmra.mrb[0].mxu1 %vm280_vm3, %v1596_v37  ;;  %v1396_v43 = vrot.slane %v1391_v6, %v1395_v41  ;;  %v1400_v44 = vrot.slane %v1391_v6, %v1399_v42 }
  0xef   : > { %1675 = vmatpush3.bf16.msra.mxu1 %v1302_v39  ;;  %1676 = vmatprep.mubr.msk.bf16.mxu1 %vm1866_vm0, %v1864_v5  ;;  %v1403_v5 = vsub.s32 2, %v1956_v3 }
  0xf1   : > { %v1404_v45 = vrot.slane %v1391_v6, %v1403_v5 }
  0xf8   : > { %1602 = vmatmul.mubr.msk.bf16.vlgmr.msra.gmra.mrb[0].mxu0 %vm280_vm3, %v1600_v40 }
  0xfa   : > { %1677 = vmatmul.mubr.msk.bf16.vlgmr.msra.gmra.mrb[0].mxu1 %vm280_vm3, %v1600_v40 }
 0x1cb   : > { %v1338_v46 = vpop.f32.mrb[0].mxu0 }
 0x1cc   : > { %1388 = vst [vmem:[%s218_s10] sm:$0xff] %v1338_v46  ;;  %v1408_v47 = vmul.f32 %v1396_v43, %v1338_v46  ;;  %v1340_v48 = vpop.f32.mrb[1].mxu0 }
 0x1cd   : > { %1389 = vst [vmem:[%s218_s10 + $0x8] sm:$0xff] %v1340_v48  ;;  %v1409_v49 = vmul.f32 %v1400_v44, %v1340_v48  ;;  %v1342_v50 = vpop.f32.mrb[2].mxu0  ;;  %v1379_v51 = vpop.f32.mrb[0].mxu1 }
 0x1ce   : > { %v1417_v52 = vmul.f32 %v1408_v47, %v1338_v46  ;;  %1390 = vst [vmem:[%s218_s10 + $0x10] sm:$0xff] %v1379_v51  ;;  %v1343_v53 = vpop.f32.mrb[3].mxu0  ;;  %v1678_v54 = vpop.f32.mrb[1].mxu1  ;;  %v1410_v55 = vmul.f32 %v1404_v45, %v1379_v51 }
 0x1cf   : > { %v1418_v3 = vmul.f32 %v1409_v49, %v1340_v48  ;;  %v1382_v56 = vpop.f32.mrb[2].mxu1  ;;  %v1411_v57 = vadd.f32 %v1409_v49, %v1408_v47 }
 0x1d0   : > { %v1679_v58 = vpop.f32.mrb[3].mxu1  ;;  %v1419_v59 = vmul.f32 %v1410_v55, %v1379_v51 }
 0x1d1   : > { %v1412_v60 = vadd.f32 %v1411_v57, %v1410_v55  ;;  %v1420_v61 = vadd.f32 %v1418_v3, %v1417_v52 }
 0x1d3   : > { %1413 = vadd.xlane.f32.xlu0 %v1412_v60  ;;  %v1421_v62 = vadd.f32 %v1420_v61, %v1419_v59 }
 0x1d5   : > { %1422 = vadd.xlane.f32.xlu1 %v1421_v62 }
 0x1d6   : > { %1812 = shalt.err (!%p1809_p3)
}
 0x1d7   : > { %s1813_s22 = scalar_lea.hbm %s2112_s15, 384  ;;  %s1817_s8 = scalar_lea.hbm %s2161_s3, 768 }
 0x1d8   : > { %p1814_p4 = scmp.ne.s32.totalorder %s2112_s15, %s1813_s22  ;;  %p1818_p9 = scmp.lt.u32.totalorder %s2112_s15, %s2161_s3 }
 0x1d9   : > { %p1819_p10 = scmp.lt.u32.totalorder %s1817_s8, %s1813_s22  ;;  %p1821_p12 = scmp.lt.u32.totalorder %s1813_s22, %s2112_s15 }
 0x1da   : > { %p1815_p7 = pnand %p1814_p4, %p1944_p5 }
 0x1db   : > { %p1820_p11 = por %p1819_p10, %p1818_p9 }
 0x1dc   : > { %p1816_p8 = pneg %p1815_p7 }
 0x1dd   : > { %p1822_p13 = por %p1821_p12, %p1820_p11 }
 0x1df   : > { %p1823_p0 = pnand %p1822_p13, %p1816_p8 }
 0x1e1   : > { %1826 = shalt.err (!%p1823_p0)
}
 0x1e2   : > { %1746 = dma.vmem_to_hbm [thread:$0]  (%p1944_p5), %s1449_s12, 384, %s2112_s15, %s1426_s16   ;;  %vm1415_vm11 = vcmask 7168  }
 0x1e3   : > { %s239_s14 = scalar_lea.vmem %s2162_s4, %s1960_s6  ;;  %s243_s25 = scalar_lea.vmem %s2163_s5, %s1960_s6 }
 0x260   : > { %v1414_v63 = vpop.xlane.xlu0 %1413 }
 0x261   : > { %1416 = vst.msk [vmem:[%s239_s14] sm:$0xff] %vm1415_vm11, %v1414_v63 }
 0x262   : > { %v1423_v0 = vpop.xlane.xlu1 %1422 }
 0x263   : > { %1424 = vst.msk [vmem:[%s243_s25] sm:$0xff] %vm1415_vm11, %v1423_v0 }
 0x264 PF: > { %p1752_p1 = scmp.ge.s32.totalorder %s1861_s21, 2  ;;  %s1466_s28 = sand.u32 1, %s1849_s18  }
 0x265   : > { %s1467_s12 = scalar_lea.sflag [#allocation3], %s1466_s28 }
 0x266   : > { %p1749_p5 = pnand %p1752_p1, %p1948_p6 }
 0x268   : > { %1844 = dma.done.wait (!%p1749_p5), %s1467_s12, 384  }
 0x269   : > { %1846 = vsyncadd (!%p1749_p5), %s1467_s12, 4294966912  ;;  %p16_p2 = scmp.ge.s32.totalorder %s1931_s24, 4   ;;  %s2166_s18 = smov %s1853_s19 }
 0x26a   : > { %s2167_s19 = smov %s1857_s20  ;;  %s2168_s20 = smov %s1942_s27 }
 0x26b   : > { %s2169_s21 = smov %s1931_s24  ;;  %18 = sbr.rel (!%p16_p2) target bundleno = 3 (0x3), region = 99 }
 0x272   :  { %1486 = vsyncpa [#allocation3], 1 }
 0x273   :  { %1488 = vsyncpa [#allocation3 + $0x1], 1 }

</bundles_post_ra>
